<compile_context>
chip_gen: v6e
topology: v6e:2x2x1
jax: 0.10.0
libtpu: 0.0.40
codegen_flags: <defaults>
</compile_context>

<pallas_src>
import functools
import math

import jax
import jax.numpy as jnp
from jax.experimental import pallas as pl
from jax.experimental.pallas import tpu as pltpu


def _round_up(x, m):
    return ((x + m - 1) // m) * m


# ---------------------------------------------------------------------------
# sinusoidal PE table (plain JAX, built once on the host side of the call)
# ---------------------------------------------------------------------------
def sinusoidal_pe(seq_len, d_model, dtype=jnp.float32):
    """Standard sinusoidal positional encoding table of shape (S, D)."""
    pos = jnp.arange(seq_len, dtype=jnp.float32)[:, None]            # (S, 1)
    half = (d_model + 1) // 2
    i = jnp.arange(half, dtype=jnp.float32)[None, :]                 # (1, ceil(D/2))
    div = jnp.exp(-(math.log(10000.0) / d_model) * (2.0 * i))
    ang = pos * div                                                  # (S, ceil(D/2))
    pe = jnp.zeros((seq_len, d_model), jnp.float32)
    pe = pe.at[:, 0::2].set(jnp.sin(ang))
    pe = pe.at[:, 1::2].set(jnp.cos(ang[:, : d_model // 2]))
    return pe.astype(dtype)


# ---------------------------------------------------------------------------
# kernel
# ---------------------------------------------------------------------------
def _embed_kernel(ids_ref, pe_ref, table_ref, out_ref, rows_ref, sem_ref, *,
                  g, scale):
    # ids_ref   : SMEM int32 (B * S_pad,)        (scalar prefetch)
    # pe_ref    : VMEM f32   (g, D)              (auto-pipelined, seq-tile resident)
    # table_ref : HBM        (V, D)              (memory_space=pl.ANY)
    # out_ref   : VMEM       (1, g, D)
    # rows_ref  : VMEM       (2*g, D)            (two gather slots)
    # sem_ref   : DMA sems   (2,)                (one per slot)
    si = pl.program_id(0)
    b = pl.program_id(1)
    nb = pl.num_programs(1)
    s_pad = pl.num_programs(0) * g       # per-batch stride in flattened ids

    def start_gather(batch_idx, slot):
        base = batch_idx * s_pad + si * g
        row0 = slot * g

        @pl.loop(0, g)
        def _(j):
            row = ids_ref[base + j]
            pltpu.make_async_copy(
                table_ref.at[pl.ds(row, 1)],        # (1, D) HBM row
                rows_ref.at[pl.ds(row0 + j, 1)],    # (1, D) VMEM row
                sem_ref.at[slot],
            ).start()

    def wait_gather(slot):
        row0 = slot * g

        @pl.loop(0, g)
        def _(j):
            pltpu.make_async_copy(
                table_ref.at[pl.ds(0, 1)],
                rows_ref.at[pl.ds(row0 + j, 1)],
                sem_ref.at[slot],
            ).wait()

    slot = b % 2

    # Prime the pipeline on the first batch step of every seq tile (shard-safe
    # on v7x: each core iterates full batch loops for its seq tiles).
    @pl.when(b == 0)
    def _():
        start_gather(b, slot)

    # Prefetch next batch step's rows into the other slot (double buffering).
    @pl.when(b + 1 < nb)
    def _():
        start_gather(b + 1, (b + 1) % 2)

    wait_gather(slot)

    # Dense epilogue: single (g, D) add + mul + store (f32 compute path).
    start = pl.multiple_of(slot * g, 8)
    rows = rows_ref[pl.ds(start, g), :]
    out = (rows.astype(jnp.float32) + pe_ref[...]) * jnp.float32(scale)
    out_ref[0] = out.astype(out_ref.dtype)


# ---------------------------------------------------------------------------
# wrapper
# ---------------------------------------------------------------------------
def embedding_forward(ids, table, d_model=None, *, rows_per_step=64,
                      interpret=False):
    """ids: (B, S) int; table: (V, D) -> (B, S, D) in table.dtype."""
    bsz, s = ids.shape
    v, d = table.shape
    if d_model is None:
        d_model = d

    # Rows gathered per grid step: multiple of 8 (sublane-dense blocks) that
    # amortizes the ~0.35 us per-step pipeline overhead.
    if s <= rows_per_step:
        g = _round_up(max(s, 1), 8)
    else:
        g = _round_up(rows_per_step, 8)
    s_pad = _round_up(s, g)
    seq_tiles = s_pad // g

    # Clamp ids so a bad id can never become an unchecked OOB DMA (NOTE: this
    # differs from PyTorch, which would raise), pad S to a multiple of g, and
    # flatten to 1D to avoid 2D SMEM (8,128) padding.
    ids32 = jnp.clip(ids.astype(jnp.int32), 0, v - 1)
    ids32 = jnp.pad(ids32, ((0, 0), (0, s_pad - s)))
    ids_flat = ids32.reshape(-1)

    pe = sinusoidal_pe(s_pad, d, jnp.float32)     # passed ONCE, (S_pad, D)

    out_dtype = table.dtype
    kernel = functools.partial(_embed_kernel, g=g, scale=math.sqrt(d_model))

    # VMEM: gather scratch (2g,D) + double-buffered PE + double-buffered out.
    itemsize = jnp.dtype(table.dtype).itemsize
    est = 2 * g * d * itemsize + 2 * g * d * 4 + 2 * g * d * jnp.dtype(out_dtype).itemsize
    vmem_limit = int(min(64 * 1024 * 1024, max(16 * 1024 * 1024, 4 * est)))

    out = pl.pallas_call(
        kernel,
        out_shape=jax.ShapeDtypeStruct((bsz, s_pad, d), out_dtype),
        grid_spec=pltpu.PrefetchScalarGridSpec(
            num_scalar_prefetch=1,                       # ids -> SMEM
            grid=(seq_tiles, bsz),                       # batch innermost
            in_specs=[
                pl.BlockSpec((g, d), lambda si, b, ids: (si, 0)),   # PE
                pl.BlockSpec(memory_space=pl.ANY),                  # table in HBM
            ],
            out_specs=pl.BlockSpec((1, g, d), lambda si, b, ids: (b, si, 0)),
            scratch_shapes=[
                pltpu.VMEM((2 * g, d), table.dtype),     # two gather slots
                pltpu.SemaphoreType.DMA((2,)),           # one sem per slot
            ],
        ),
        compiler_params=pltpu.CompilerParams(
            dimension_semantics=("parallel", "arbitrary"),
            vmem_limit_bytes=vmem_limit,
        ),
        interpret=interpret,
    )(ids_flat, pe, table)

    return out[:, :s, :]


# ---------------------------------------------------------------------------
# self-test
# ---------------------------------------------------------------------------
if __name__ == "__main__":
    B, S = 2, 12              # S not a multiple of 8 -> exercises the pad path
    VOCAB, D_MODEL = 64, 128

    key = jax.random.PRNGKey(0)
    k_ids, k_tab = jax.random.split(key)

    ids = jax.random.randint(k_ids, (B, S), 0, VOCAB, dtype=jnp.int32)
    table = jax.random.normal(k_tab, (VOCAB, D_MODEL), dtype=jnp.float32)

    out = embedding_forward(ids, table, D_MODEL)
    jax.block_until_ready(out)

    # Pure-JAX reference: (embedding(x) + PE) * sqrt(d_model)  — module order.
    ref = (table[ids] + sinusoidal_pe(S, D_MODEL)[None, :, :]) * math.sqrt(D_MODEL)
    assert out.shape == (B, S, D_MODEL)
    err = float(jnp.max(jnp.abs(out - ref)))
    assert jnp.allclose(out, ref, atol=1e-4, rtol=1e-4), err

    print("KERNEL_OK")
</pallas_src>

<mosaic_0001>
module attributes {stable_mosaic.version = 11 : i64} {
  func.func @_embed_kernel(%arg0: i32, %arg1: i32, %arg2: memref<32xi32, #tpu.memory_space<smem>>, %arg3: memref<16x128xf32, #tpu.memory_space<vmem>>, %arg4: memref<64x128xf32, #tpu.memory_space<any>>, %arg5: memref<1x16x128xf32, #tpu.memory_space<vmem>>, %arg6: memref<32x128xf32, #tpu.memory_space<vmem>>, %arg7: memref<2x!tpu.dma_semaphore, #tpu.memory_space<semaphore_mem>>) attributes {dimension_semantics = [#tpu.dimension_semantics<parallel>, #tpu.dimension_semantics<arbitrary>], iteration_bounds = array<i64: 1, 2>, scalar_prefetch = 1 : i64, scratch_operands = 2 : i64, tpu.core_type = #tpu.core_type<tc>, window_params = [{transform_indices = @transform_0, window_bounds = array<i64: 16, 128>}, {}, {transform_indices = @transform_2, window_bounds = array<i64: 1, 16, 128>}]} {
    %c2_i32 = arith.constant 2 : i32
    %c0_i32 = arith.constant 0 : i32
    %0 = arith.cmpi eq, %c2_i32, %c0_i32 : i32
    %c1_i32 = arith.constant 1 : i32
    %1 = arith.select %0, %c1_i32, %c2_i32 : i32
    %2 = arith.remsi %arg1, %1 : i32
    %c0_i32_0 = arith.constant 0 : i32
    %3 = arith.cmpi ne, %2, %c0_i32_0 : i32
    %c0_i32_1 = arith.constant 0 : i32
    %4 = arith.cmpi slt, %2, %c0_i32_1 : i32
    %c0_i32_2 = arith.constant 0 : i32
    %5 = arith.cmpi slt, %1, %c0_i32_2 : i32
    %6 = arith.xori %4, %5 : i1
    %7 = arith.andi %6, %3 : i1
    %8 = arith.addi %2, %1 : i32
    %9 = arith.select %7, %8, %2 : i32
    %c0_i32_3 = arith.constant 0 : i32
    %10 = arith.cmpi eq, %arg1, %c0_i32_3 : i32
    %11 = arith.extui %10 : i1 to i32
    %c0_i32_4 = arith.constant 0 : i32
    %12 = arith.cmpi ne, %11, %c0_i32_4 : i32
    scf.if %12 {
      %c16_i32_18 = arith.constant 16 : i32
      %30 = arith.muli %arg1, %c16_i32_18 : i32
      %c16_i32_19 = arith.constant 16 : i32
      %31 = arith.muli %arg0, %c16_i32_19 : i32
      %32 = arith.addi %30, %31 : i32
      %c16_i32_20 = arith.constant 16 : i32
      %33 = arith.muli %9, %c16_i32_20 : i32
      %c0_i32_21 = arith.constant 0 : i32
      %c16_i32_22 = arith.constant 16 : i32
      %34 = arith.addi %c0_i32_21, %c16_i32_22 : i32
      %c1_i32_23 = arith.constant 1 : i32
      scf.for %arg8 = %c0_i32_21 to %34 step %c1_i32_23  : i32 {
        %c1_i32_25 = arith.constant 1 : i32
        %35 = arith.muli %arg8, %c1_i32_25 : i32
        %c0_i32_26 = arith.constant 0 : i32
        %36 = arith.addi %c0_i32_26, %35 : i32
        %37 = arith.addi %32, %36 : i32
        %38 = arith.index_cast %37 : i32 to index
        %39 = memref.load %arg2[%38] : memref<32xi32, #tpu.memory_space<smem>>
        %40 = arith.addi %33, %36 : i32
        %c0_i32_27 = arith.constant 0 : i32
        %41 = tpu.memref_slice %arg4[%39, %c0_i32_27] : memref<64x128xf32, #tpu.memory_space<any>> -> memref<1x128xf32, #tpu.memory_space<any>>
        %c0_i32_28 = arith.constant 0 : i32
        %42 = tpu.memref_slice %arg6[%40, %c0_i32_28] : memref<32x128xf32, #tpu.memory_space<vmem>> -> memref<1x128xf32, #tpu.memory_space<vmem>>
        %43 = tpu.memref_slice %arg7[%9] : memref<2x!tpu.dma_semaphore, #tpu.memory_space<semaphore_mem>> -> memref<1x!tpu.dma_semaphore, #tpu.memory_space<semaphore_mem>>
        %44 = tpu.memref_squeeze %43 : memref<1x!tpu.dma_semaphore, #tpu.memory_space<semaphore_mem>> -> memref<!tpu.dma_semaphore, #tpu.memory_space<semaphore_mem>>
        tpu.enqueue_dma source(%41 : memref<1x128xf32, #tpu.memory_space<any>>) target(%42 : memref<1x128xf32, #tpu.memory_space<vmem>>) target_semaphore(%44 : memref<!tpu.dma_semaphore, #tpu.memory_space<semaphore_mem>>)
      }
      %c16_i32_24 = arith.constant 16 : i32
    } else {
    }
    %c1_i32_5 = arith.constant 1 : i32
    %13 = arith.addi %arg1, %c1_i32_5 : i32
    %c2_i32_6 = arith.constant 2 : i32
    %14 = arith.cmpi slt, %13, %c2_i32_6 : i32
    %15 = arith.extui %14 : i1 to i32
    %c0_i32_7 = arith.constant 0 : i32
    %16 = arith.cmpi ne, %15, %c0_i32_7 : i32
    scf.if %16 {
      %c1_i32_18 = arith.constant 1 : i32
      %30 = arith.addi %arg1, %c1_i32_18 : i32
      %c1_i32_19 = arith.constant 1 : i32
      %31 = arith.addi %arg1, %c1_i32_19 : i32
      %c2_i32_20 = arith.constant 2 : i32
      %c0_i32_21 = arith.constant 0 : i32
      %32 = arith.cmpi eq, %c2_i32_20, %c0_i32_21 : i32
      %c1_i32_22 = arith.constant 1 : i32
      %33 = arith.select %32, %c1_i32_22, %c2_i32_20 : i32
      %34 = arith.remsi %31, %33 : i32
      %c0_i32_23 = arith.constant 0 : i32
      %35 = arith.cmpi ne, %34, %c0_i32_23 : i32
      %c0_i32_24 = arith.constant 0 : i32
      %36 = arith.cmpi slt, %34, %c0_i32_24 : i32
      %c0_i32_25 = arith.constant 0 : i32
      %37 = arith.cmpi slt, %33, %c0_i32_25 : i32
      %38 = arith.xori %36, %37 : i1
      %39 = arith.andi %38, %35 : i1
      %40 = arith.addi %34, %33 : i32
      %41 = arith.select %39, %40, %34 : i32
      %c16_i32_26 = arith.constant 16 : i32
      %42 = arith.muli %30, %c16_i32_26 : i32
      %c16_i32_27 = arith.constant 16 : i32
      %43 = arith.muli %arg0, %c16_i32_27 : i32
      %44 = arith.addi %42, %43 : i32
      %c16_i32_28 = arith.constant 16 : i32
      %45 = arith.muli %41, %c16_i32_28 : i32
      %c0_i32_29 = arith.constant 0 : i32
      %c16_i32_30 = arith.constant 16 : i32
      %46 = arith.addi %c0_i32_29, %c16_i32_30 : i32
      %c1_i32_31 = arith.constant 1 : i32
      scf.for %arg8 = %c0_i32_29 to %46 step %c1_i32_31  : i32 {
        %c1_i32_33 = arith.constant 1 : i32
        %47 = arith.muli %arg8, %c1_i32_33 : i32
        %c0_i32_34 = arith.constant 0 : i32
        %48 = arith.addi %c0_i32_34, %47 : i32
        %49 = arith.addi %44, %48 : i32
        %50 = arith.index_cast %49 : i32 to index
        %51 = memref.load %arg2[%50] : memref<32xi32, #tpu.memory_space<smem>>
        %52 = arith.addi %45, %48 : i32
        %c0_i32_35 = arith.constant 0 : i32
        %53 = tpu.memref_slice %arg4[%51, %c0_i32_35] : memref<64x128xf32, #tpu.memory_space<any>> -> memref<1x128xf32, #tpu.memory_space<any>>
        %c0_i32_36 = arith.constant 0 : i32
        %54 = tpu.memref_slice %arg6[%52, %c0_i32_36] : memref<32x128xf32, #tpu.memory_space<vmem>> -> memref<1x128xf32, #tpu.memory_space<vmem>>
        %55 = tpu.memref_slice %arg7[%41] : memref<2x!tpu.dma_semaphore, #tpu.memory_space<semaphore_mem>> -> memref<1x!tpu.dma_semaphore, #tpu.memory_space<semaphore_mem>>
        %56 = tpu.memref_squeeze %55 : memref<1x!tpu.dma_semaphore, #tpu.memory_space<semaphore_mem>> -> memref<!tpu.dma_semaphore, #tpu.memory_space<semaphore_mem>>
        tpu.enqueue_dma source(%53 : memref<1x128xf32, #tpu.memory_space<any>>) target(%54 : memref<1x128xf32, #tpu.memory_space<vmem>>) target_semaphore(%56 : memref<!tpu.dma_semaphore, #tpu.memory_space<semaphore_mem>>)
      }
      %c16_i32_32 = arith.constant 16 : i32
    } else {
    }
    %c16_i32 = arith.constant 16 : i32
    %17 = arith.muli %9, %c16_i32 : i32
    %c0_i32_8 = arith.constant 0 : i32
    %c16_i32_9 = arith.constant 16 : i32
    %18 = arith.addi %c0_i32_8, %c16_i32_9 : i32
    %c1_i32_10 = arith.constant 1 : i32
    scf.for %arg8 = %c0_i32_8 to %18 step %c1_i32_10  : i32 {
      %c1_i32_18 = arith.constant 1 : i32
      %30 = arith.muli %arg8, %c1_i32_18 : i32
      %c0_i32_19 = arith.constant 0 : i32
      %31 = arith.addi %c0_i32_19, %30 : i32
      %32 = arith.addi %17, %31 : i32
      %c0_i32_20 = arith.constant 0 : i32
      %c0_i32_21 = arith.constant 0 : i32
      %33 = tpu.memref_slice %arg4[%c0_i32_20, %c0_i32_21] : memref<64x128xf32, #tpu.memory_space<any>> -> memref<1x128xf32, #tpu.memory_space<any>>
      %c0_i32_22 = arith.constant 0 : i32
      %34 = tpu.memref_slice %arg6[%32, %c0_i32_22] : memref<32x128xf32, #tpu.memory_space<vmem>> -> memref<1x128xf32, #tpu.memory_space<vmem>>
      %35 = tpu.memref_slice %arg7[%9] : memref<2x!tpu.dma_semaphore, #tpu.memory_space<semaphore_mem>> -> memref<1x!tpu.dma_semaphore, #tpu.memory_space<semaphore_mem>>
      %36 = tpu.memref_squeeze %35 : memref<1x!tpu.dma_semaphore, #tpu.memory_space<semaphore_mem>> -> memref<!tpu.dma_semaphore, #tpu.memory_space<semaphore_mem>>
      tpu.wait_dma2 semaphore(%36 : memref<!tpu.dma_semaphore, #tpu.memory_space<semaphore_mem>>) src(%33 : memref<1x128xf32, #tpu.memory_space<any>>) dst(%34 : memref<1x128xf32, #tpu.memory_space<vmem>>)
    }
    %c16_i32_11 = arith.constant 16 : i32
    %c16_i32_12 = arith.constant 16 : i32
    %19 = arith.muli %9, %c16_i32_12 : i32
    %20 = tpu.assume_multiple %19, 8 : i32
    %21 = arith.index_cast %20 : i32 to index
    %c0 = arith.constant 0 : index
    %22 = vector.load %arg6[%21, %c0] : memref<32x128xf32, #tpu.memory_space<vmem>>, vector<16x128xf32>
    %c0_13 = arith.constant 0 : index
    %c0_14 = arith.constant 0 : index
    %23 = vector.load %arg3[%c0_13, %c0_14] : memref<16x128xf32, #tpu.memory_space<vmem>>, vector<16x128xf32>
    %24 = arith.addf %22, %23 : vector<16x128xf32>
    %cst = arith.constant 11.3137083 : f32
    %25 = vector.broadcast %cst : f32 to vector<16x128xf32>
    %26 = arith.mulf %24, %25 : vector<16x128xf32>
    %c0_15 = arith.constant 0 : index
    %c0_16 = arith.constant 0 : index
    %c0_17 = arith.constant 0 : index
    %27 = vector.load %arg5[%c0_15, %c0_16, %c0_17] : memref<1x16x128xf32, #tpu.memory_space<vmem>>, vector<1x16x128xf32>
    %28 = vector.shape_cast %27 : vector<1x16x128xf32> to vector<16x128xf32>
    %29 = vector.shape_cast %26 : vector<16x128xf32> to vector<1x16x128xf32>
    tpu.vector_store %arg5[%c0_15, %c0_16, %c0_17], %29 {strides = array<i32>} : memref<1x16x128xf32, #tpu.memory_space<vmem>>, vector<1x16x128xf32>,
    return
  }
  func.func @transform_0(%arg0: i32, %arg1: i32, %arg2: memref<32xi32, #tpu.memory_space<smem>>) -> (i32, i32) {
    %c0_i32 = arith.constant 0 : i32
    %c0_i32_0 = arith.constant 0 : i32
    return %arg0, %c0_i32 : i32, i32
  }
  func.func @transform_2(%arg0: i32, %arg1: i32, %arg2: memref<32xi32, #tpu.memory_space<smem>>) -> (i32, i32, i32) {
    %c0_i32 = arith.constant 0 : i32
    %c0_i32_0 = arith.constant 0 : i32
    return %arg1, %arg0, %c0_i32 : i32, i32, i32
  }
}

</mosaic_0001>

<bundles_post_ra>
// kernel: tpu_custom_call.1
= control target key start
LH: loop header
LB: loop body
LE: loop exit
PB: predicated region body
PF: predicated region fallthrough
CT: control target
= control target key end

     0   :  { %s700_s12 = smov [#allocation5]   ;;  %s935_s0 = inlined_call_operand.hbm [shape: s32[32], index: 0, kind: input, shape index: {}]   ;;  %s936_s1 = inlined_call_operand.hbm [shape: f32[16,128], index: 1, kind: input, shape index: {}]   ;;  %s937_s2 = inlined_call_operand.hbm [shape: f32[64,128], index: 2, kind: input, shape index: {}]   ;;  %s938_s3 = inlined_call_operand.hbm [shape: f32[2,16,128], index: 3, kind: output, shape index: {}]  }
   0x1   :  { %942 = sst [smem:[#allocation23_spill]] %s936_s1 }
   0x2   :  { %9 = dma.hbm_to_smem %s935_s0, 16, %s700_s12, [#allocation4] }
   0x3   :  { %652 = dma.done.wait [#allocation4], 16 }
   0x4   :  { %653 = vsyncadd [#allocation4], 4294967280 }
   0x5   :  { %11 = sfence }
   0x6   :  { %12 = vsyncpa [#allocation7], 0 }
   0x7   :  { %13 = vsyncpa [#allocation8], 0 }
   0x8   :  { %15 = vsyncpa [#allocation8 + $0x1], 0  ;;  %s732_s15 = smov 0   ;;  %s734_s16 = smov 0  }
   0x9   :  { %s736_s17 = smov 0   ;;  %s738_s18 = smov 0  }
   0xa   :  { %s740_s19 = smov 0   ;;  %s742_s20 = smov 0  }
   0xb LB: > { %943 = sst [smem:[#allocation20_spill]] %s682_s19  ;;  %s385_s0 = sadd.s32 4294967295, %s686_s20   ;;  %s686_s20 = sphi %s742_s20, %s21_s20   ;;  %s682_s19 = sphi %s740_s19, %s955_s19   ;;  %s678_s18 = sphi %s738_s18, %s954_s18   ;;  %s674_s17 = sphi %s736_s17, %s958_s17   ;;  %s670_s16 = sphi %s734_s16, %s957_s16   ;;  %s666_s15 = sphi %s732_s15, %s956_s15  }
   0xc   : > { %s386_s21 = sadd.s32 4294967294, %s686_s20   ;;  %s30_s22 = sadd.s32 1, %s682_s19 }
   0xd   : > { %s68_s23 = sadd.s32 1, %s674_s17  ;;  %p31_p0 = scmp.ge.s32.totalorder %s30_s22, 2 }
   0xe   : > { %p78_p1 = scmp.ne.s32.totalorder %s674_s17, %s670_s16  ;;  %p79_p2 = scmp.eq.s32.totalorder %s385_s0, 1 }
   0xf   : > { %p84_p3 = scmp.ne.s32.totalorder %s670_s16, %s666_s15  ;;  %s960_s22 = smov (%p31_p0, %s30_s22), 0 }
  0x10   : > { %944 = sst [smem:[#allocation21_spill]] %s960_s22  ;;  %p772_p4 = por %p79_p2, %p78_p1 }
  0x11   : > { %p85_p5 = scmp.eq.s32.totalorder %s386_s21, 1  ;;  %s63_s25 = ssub.s32 %s682_s19, %s960_s22 }
  0x12   : > { %p387_p6 = scmp.ge.s32.totalorder %s686_s20, 1  ;;  %p66_p7 = scmp.eq.s32.totalorder %s63_s25, 0 }
  0x13   : > { %p779_p8 = por %p85_p5, %p84_p3  ;;  %p92_p9 = scmp.lt.s32.totalorder %s686_s20, 3 }
  0x14   : > { %s785_s27 = scalar_select %p66_p7, %s674_s17, %s68_s23  }
  0x15   : > { %p787_p10 = pnand %p387_p6, %p92_p9  ;;  %p791_p11 = scmp.eq.s32.totalorder %s385_s0, 0 }
  0x16   : > { %s701_s30 = smov [#allocation6]  }
  0x17   : > { %p423_p12 = pneg %p787_p10  ;;  %s107_s4 = sshll.u32 %s701_s30, 4  ;;  %s108_s4 = int_to_ptr.vmem [resolvable:$true] %s107_s4 }
  0x18   : > { %s531_s5 = scalar_lea.vmem %s108_s4, 256  ;;  %p539_p5 = scmp.lt.s32.totalorder %s108_s4, %s108_s4 }
  0x19   : > { %p424_p13 = pnand %p791_p11, %p423_p12  ;;  %p532_p1 = scmp.ne.s32.totalorder %s108_s4, %s531_s5 }
  0x1a   : > { %p540_p6 = scmp.lt.s32.totalorder %s531_s5, %s531_s5 }
  0x1b   : > { %p522_p0 = pneg %p424_p13 }
  0x1c   : > { %p541_p7 = por %p540_p6, %p539_p5 }
  0x1d   : > { %p534_p2 = pnand %p532_p1, %p522_p0 }
  0x1f   : > { %p535_p3 = pneg %p534_p2 }
  0x21   : > { %p542_p9 = pnand %p541_p7, %p535_p3 }
  0x23   : > { %545 = shalt.err (!%p542_p9)
}
  0x24   : > { %s702_s6 = smov 128   ;;  %s703_s7 = smov 8  }
  0x25   : > { %s949_s1 = sld [smem:[#allocation23_spill]] }
  0x27   : > { %123 = sbr.rel (%p787_p10) target bundleno = 178 (0xb2), region = 24 }
  0x2b   : > { %426 = dma.hbm_to_vmem [thread:$0]  (!%p424_p13), %s949_s1, 256, %s108_s4, [#allocation7], %s702_s6, %s702_s6, %s703_s7  }
  0x2c   : > { %655 = dma.done.wait (%p791_p11), [#allocation7], 256  }
  0x2d   : > { %657 = vsyncadd (%p791_p11), [#allocation7], 4294967040  ;;  %s939_s10 = sand.u32 1, %s670_s16   ;;  %p140_p12 = scmp.lt.s32.totalorder %s678_s18, 0 }
  0x2e   : > { %s391_s11 = sshll.u32 %s939_s10, 4  ;;  %s141_s12 = ssub.s32 0, %s678_s18 }
  0x2f   : > { %s392_s13 = smin.u32 %s678_s18, %s141_s12  ;;  %s816_s23 = scalar_lea.vmem [#allocation9], %s391_s11 }
  0x30   : > { %s143_s14 = sand.u32 1, %s392_s13   ;;  %p395_p11 = scmp.ne.s32.totalorder %s678_s18, 0 }
  0x31   : > { %s144_s0 = ssub.s32 0, %s143_s14  ;;  %s821_s29 = smov (!%p395_p11), 0  }
  0x32   : > { %s962_s0 = smov (!%p140_p12, %s144_s0), %s143_s14  ;;  %155 = sbr.rel (%p395_p11) target bundleno = 92 (0x5c), region = 32 }
  0x33   : > { %p394_p10 = scmp.lt.s32.totalorder %s962_s0, 0  ;;  %s150_s21 = sadd.s32 2, %s962_s0 }
  0x35   : > { %s964_s21 = smov (!%p394_p10, %s150_s21), %s962_s0 }
  0x36   : > { %s397_s28 = sshll.u32 (!%p395_p11), %s964_s21, 4 }
  0x37 LB: >> { %s950_s25 = sshll.u32 %s678_s18, 4  ;;  %s168_s4 = sadd.s32 %s690_s29, %s397_s28  ;;  %s690_s29 = sphi %s821_s29, %s165_s29  }
  0x38   : >> { %s166_s30 = sadd.s32 %s690_s29, %s950_s25  ;;  %s171_s6 = scalar_lea.vmem [#allocation2], %s168_s4 }
  0x39   : >> { %s167_s5 = sld [smem:[#allocation5 + %s166_s30]]  ;;  %s180_s7 = sshll.u32 %s171_s6, 4  ;;  %s181_s7 = int_to_ptr.vmem [resolvable:$true] %s180_s7 }
  0x3a   : >> { %s172_s13 = scalar_lea.sflag [#allocation3], %s964_s21  ;;  %s548_s1 = scalar_lea.hbm %s937_s2, 1024 }
  0x3f   : >> { %s398_s8 = sshll.u32 %s167_s5, 4 }
  0x40   : >> { %s170_s12 = scalar_lea.hbm %s937_s2, %s398_s8 }
  0x41   : >> { %s546_s14 = scalar_lea.hbm %s170_s12, 16  ;;  %p549_p0 = scmp.lt.s32.totalorder %s170_s12, %s937_s2 }
  0x42   : >> { %p547_p13 = scmp.ne.s32.totalorder %s170_s12, %s546_s14  ;;  %p550_p1 = scmp.lt.s32.totalorder %s548_s1, %s546_s14 }
  0x44   : >> { %p551_p2 = por %p550_p1, %p549_p0 }
  0x46   : >> { %p552_p3 = pnand %p551_p2, %p547_p13 }
  0x48   : >> { %555 = shalt.err (!%p552_p3)  }
  0x49   : >> { %s556_s30 = scalar_lea.vmem %s181_s7, 16  ;;  %s704_s4 = smov [#allocation2]  }
  0x4a   : >> { %p557_p5 = scmp.ne.s32.totalorder %s181_s7, %s556_s30  ;;  %s558_s5 = sshll.u32 %s704_s4, 4  ;;  %s559_s5 = int_to_ptr.vmem [resolvable:$false] %s558_s5 }
  0x4b   : >> { %s560_s6 = scalar_lea.vmem %s559_s5, 512  ;;  %p561_p6 = scmp.lt.s32.totalorder %s181_s7, %s559_s5 }
  0x4c   : >> { %p562_p7 = scmp.lt.s32.totalorder %s560_s6, %s556_s30 }
  0x4e   : >> { %p563_p9 = por %p562_p7, %p561_p6 }
  0x50   : >> { %p564_p12 = pnand %p563_p9, %p557_p5 }
  0x52   : >> { %567 = shalt.err (!%p564_p12)  }
  0x53   : >> { %183 = dma.hbm_to_vmem [thread:$0]  %s170_s12, 16, %s181_s7, %s172_s13 }
  0x54   : >> { %s165_s29 = sadd.s32 1, %s690_s29  }
  0x55   : >> { %p162_p10 = scmp.ge.s32.totalorder %s165_s29, 16  }
  0x57   : > { %164 = sbr.rel (!%p162_p10) target bundleno = 55 (0x37), region = 108 }
  0x5c PF: > { %s184_s1 = sadd.s32 1, %s678_s18 }
  0x5d   : > { %p399_p11 = scmp.ge.s32.totalorder %s184_s1, 2 }
  0x5e   : > { %p189_p13 = scmp.lt.s32.totalorder (!%p399_p11), %s184_s1, 0  ;;  %s190_s22 = ssub.s32 (!%p399_p11), 0, %s184_s1 }
  0x5f   : > { %188 = sbr.rel (%p399_p11) target bundleno = 147 (0x93), region = 47  ;;  %s400_s10 = smin.u32 (!%p399_p11), %s190_s22, %s184_s1 }
  0x60   : > { %s414_s25 = sshll.u32 (!%p399_p11), %s678_s18, 4  ;;  %s192_s8 = sand.u32 (!%p399_p11), 1, %s400_s10  }
  0x61   : > { %s847_s9 = sadd.s32 (!%p399_p11), 16, %s414_s25  ;;  %s193_s7 = ssub.s32 (!%p399_p11), 0, %s192_s8 }
  0x62   : > { %951 = sst [smem:[#allocation22_spill]] (!%p399_p11), %s847_s9  ;;  %s852_s29 = smov (!%p399_p11), 0  }
  0x64   : > { %s966_s7 = smov (!%p189_p13, %s193_s7), %s192_s8 }
  0x65   : > { %p402_p0 = scmp.lt.s32.totalorder %s966_s7, 0  ;;  %s199_s11 = sadd.s32 2, %s966_s7 }
  0x67   : > { %s968_s11 = smov (!%p402_p0, %s199_s11), %s966_s7 }
  0x68   : > { %s404_s28 = sshll.u32 %s968_s11, 4 }
  0x69 LB: >> { %s952_s9 = sld [smem:[#allocation22_spill]]  ;;  %s213_s13 = sadd.s32 %s694_s29, %s404_s28  ;;  %s694_s29 = sphi %s852_s29, %s210_s29  }
  0x6a   : >> { %s216_s0 = scalar_lea.vmem [#allocation2], %s213_s13  ;;  %s217_s22 = scalar_lea.sflag [#allocation3], %s968_s11 }
  0x6b   : >> { %s225_s30 = sshll.u32 %s216_s0, 4  ;;  %s570_s7 = scalar_lea.hbm %s937_s2, 1024  ;;  %s226_s30 = int_to_ptr.vmem [resolvable:$true] %s225_s30 }
  0x6f   : >> { %s211_s12 = sadd.s32 %s694_s29, %s952_s9 }
  0x70   : >> { %s212_s14 = sld [smem:[#allocation5 + %s211_s12]] }
  0x76   : >> { %s405_s4 = sshll.u32 %s212_s14, 4 }
  0x77   : >> { %s215_s1 = scalar_lea.hbm %s937_s2, %s405_s4 }
  0x78   : >> { %s568_s10 = scalar_lea.hbm %s215_s1, 16  ;;  %p571_p2 = scmp.lt.s32.totalorder %s215_s1, %s937_s2 }
  0x79   : >> { %p569_p1 = scmp.ne.s32.totalorder %s215_s1, %s568_s10  ;;  %p572_p3 = scmp.lt.s32.totalorder %s570_s7, %s568_s10 }
  0x7b   : >> { %p573_p5 = por %p572_p3, %p571_p2 }
  0x7d   : >> { %p574_p6 = pnand %p573_p5, %p569_p1 }
  0x7f   : >> { %577 = shalt.err (!%p574_p6)  }
  0x80   : >> { %s578_s12 = scalar_lea.vmem %s226_s30, 16  ;;  %s705_s13 = smov [#allocation2]  }
  0x81   : >> { %p579_p7 = scmp.ne.s32.totalorder %s226_s30, %s578_s12  ;;  %s580_s14 = sshll.u32 %s705_s13, 4  ;;  %s581_s14 = int_to_ptr.vmem [resolvable:$false] %s580_s14 }
  0x82   : >> { %s582_s0 = scalar_lea.vmem %s581_s14, 512  ;;  %p583_p9 = scmp.lt.s32.totalorder %s226_s30, %s581_s14 }
  0x83   : >> { %p584_p12 = scmp.lt.s32.totalorder %s582_s0, %s578_s12 }
  0x85   : >> { %p585_p10 = por %p584_p12, %p583_p9 }
  0x87   : >> { %p586_p11 = pnand %p585_p10, %p579_p7 }
  0x89   : >> { %589 = shalt.err (!%p586_p11)  }
  0x8a   : >> { %228 = dma.hbm_to_vmem [thread:$0]  %s215_s1, 16, %s226_s30, %s217_s22 }
  0x8b   : >> { %s210_s29 = sadd.s32 1, %s694_s29  }
  0x8c   : >> { %p207_p13 = scmp.ge.s32.totalorder %s210_s29, 16  }
  0x8e   : > { %209 = sbr.rel (!%p207_p13) target bundleno = 105 (0x69), region = 119 }
  0x93 PF: > { %s406_s19 = sshll.u32 %s964_s21, 4  ;;  %s696_s9 = smov 0  }
  0x94 LB: >> { %s236_s4 = scalar_lea.sflag [#allocation3], %s964_s21  ;;  %s698_s9 = sphi %s696_s9, %s235_s9  }
  0x95   : >> { %658 = dma.done.wait %s236_s4, 16 }
  0x96   : >> { %659 = vsyncadd %s236_s4, 4294967280  ;;  %s235_s9 = sadd.s32 1, %s698_s9  }
  0x97   : >> { %p232_p0 = scmp.ge.s32.totalorder %s235_s9, 16  }
  0x98   : > { %v243_v0 = vld [vmem:[#allocation6] sm:$0xff] (%p232_p0)  ;;  %v244_v1 = vld [vmem:[#allocation6 + $0x8] sm:$0xff] (%p232_p0)  ;;  %s240_s11 = scalar_lea.vmem (%p232_p0), [#allocation2], %s406_s19  ;;  %s416_s28 = sshll.u32 (%p232_p0), %s678_s18, 8 }
  0x99   : > { %234 = sbr.rel (!%p232_p0) target bundleno = 148 (0x94), region = 130  ;;  %v241_v2 = vld [vmem:[%s240_s11] sm:$0xff] (%p232_p0)  ;;  %v242_v3 = vld [vmem:[%s240_s11 + $0x8] sm:$0xff] (%p232_p0)  ;;  %s267_s29 = sshll.u32 (%p232_p0), %s816_s23, 4  ;;  %s884_s29 = int_to_ptr.vmem [resolvable:$true] %s267_s29 }
  0x9a   : > { %v245_v4 = vadd.f32 (%p232_p0), %v243_v0, %v241_v2  ;;  %v246_v5 = vadd.f32 (%p232_p0), %v244_v1, %v242_v3  ;;  %s882_s6 = scalar_lea.hbm (%p232_p0), %s938_s3, %s416_s28  ;;  %s953_s21 = sand.u32 (%p232_p0), 1, %s670_s16  }
  0x9b   : > { %s890_s1 = scalar_lea.sflag (%p232_p0), [#allocation8], %s953_s21  ;;  %s590_s18 = scalar_lea.vmem (%p232_p0), %s884_s29, 256 }
  0x9c   : > { %v247_v6 = vmul.f32 (%p232_p0), 11.313708, %v245_v4  ;;  %v248_v7 = vmul.f32 (%p232_p0), 11.313708, %v246_v5  ;;  %p591_p1 = scmp.ne.s32.totalorder (%p232_p0), %s884_s29, %s590_s18  ;;  %s706_s22 = smov (%p232_p0), [#allocation9]  }
  0x9d   : > { %s594_s10 = sshll.u32 (%p232_p0), %s706_s22, 4  ;;  %s595_s10 = int_to_ptr.vmem [resolvable:$false] %s594_s10 }
  0x9e   : > { %249 = vst [vmem:[%s816_s23] sm:$0xff] %v247_v6  ;;  %250 = vst [vmem:[%s816_s23 + $0x8] sm:$0xff] %v248_v7  ;;  %p592_p2 = pnand %p591_p1, %p772_p4  ;;  %s596_s25 = scalar_lea.vmem %s595_s10, 512 }
  0x9f   : > { %p597_p5 = scmp.lt.s32.totalorder %s884_s29, %s595_s10  ;;  %p598_p6 = scmp.lt.s32.totalorder %s596_s25, %s590_s18 }
  0xa0   : > { %p593_p3 = pneg %p592_p2 }
  0xa1   : > { %p599_p7 = por %p598_p6, %p597_p5 }
  0xa3   : > { %p600_p9 = pnand %p599_p7, %p593_p3 }
  0xa5   : > { %603 = shalt.err (!%p600_p9)
}
  0xa6   : > { %s604_s23 = scalar_lea.hbm %s882_s6, 256  ;;  %s608_s12 = scalar_lea.hbm %s938_s3, 512 }
  0xa7   : > { %p605_p12 = scmp.ne.s32.totalorder %s882_s6, %s604_s23  ;;  %p609_p13 = scmp.lt.s32.totalorder %s882_s6, %s938_s3 }
  0xa8   : > { %p610_p0 = scmp.lt.s32.totalorder %s608_s12, %s604_s23 }
  0xa9   : > { %p606_p10 = pnand %p605_p12, %p772_p4 }
  0xaa   : > { %p611_p1 = por %p610_p0, %p609_p13 }
  0xab   : > { %p607_p11 = pneg %p606_p10 }
  0xad   : > { %p612_p2 = pnand %p611_p1, %p607_p11 }
  0xaf   : > { %615 = shalt.err (!%p612_p2)
}
  0xb0   : > { %s707_s0 = smov 128   ;;  %s708_s19 = smov 8  }
  0xb1   : > { %421 = dma.vmem_to_hbm [thread:$0]  (%p772_p4), %s884_s29, 256, %s882_s6, %s890_s1, %s707_s0, %s707_s0, %s708_s19  }
  0xb2 PF: > { %p433_p3 = scmp.ge.s32.totalorder %s686_s20, 2  ;;  %s282_s9 = sand.u32 1, %s666_s15  }
  0xb3   : > { %s283_s4 = scalar_lea.sflag [#allocation8], %s282_s9 }
  0xb4   : > { %p428_p5 = pnand %p433_p3, %p779_p8 }
  0xb6   : > { %p429_p6 = pneg %p428_p5 }
  0xb8   : > { %661 = dma.done.wait (%p429_p6), %s283_s4, 256  }
  0xb9   : > { %663 = vsyncadd (%p429_p6), %s283_s4, 4294967040  ;;  %s21_s20 = sadd.s32 1, %s686_s20   ;;  %s954_s18 = sld [smem:[#allocation20_spill]] }
  0xba   : > { %p18_p7 = scmp.ge.s32.totalorder %s21_s20, 4   ;;  %s955_s19 = sld [smem:[#allocation21_spill]] }
  0xbb   : > { %s956_s15 = smov %s670_s16  ;;  %s957_s16 = smov %s674_s17 }
  0xbc   : > { %s958_s17 = smov %s785_s27  ;;  %20 = sbr.rel (!%p18_p7) target bundleno = 11 (0xb), region = 141 }
  0xc1   :  { %288 = vsyncpa [#allocation7], 1 }
  0xc2   :  { %290 = vsyncpa [#allocation7 + $0x1], 1 }
  0xc3   :  { %291 = vsyncpa [#allocation8], 1 }
  0xc4   :  { %293 = vsyncpa [#allocation8 + $0x1], 1 }
  0xc5   :  { %294 = vsyncmov [#allocation3] }
  0xc8   :  { %s295_s24 = vpop.sfrf %294 }
  0xc9   :  { %p412_p4 = scmp.ne.s32.totalorder %s295_s24, 0 }
  0xcb   :  { %299 = shalt.err (%p412_p4)  }
  0xcc   :  { %301 = vsyncmov [#allocation3 + $0x1] }
  0xcf   :  { %s302_s26 = vpop.sfrf %301 }
  0xd0   :  { %p413_p8 = scmp.ne.s32.totalorder %s302_s26, 0 }
  0xd2   :  { %306 = shalt.err (%p413_p8)  }

</bundles_post_ra>
